<compile_context>
chip_gen: v7x
topology: tpu7x:2x2x1
jax: 0.10.0
libtpu: 0.0.40
codegen_flags: <defaults>
</compile_context>

<pallas_src>
import functools

import jax
import jax.numpy as jnp
from jax.experimental import pallas as pl
from jax.experimental.pallas import tpu as pltpu


def _round_up(x, m):
    return ((x + m - 1) // m) * m


def _cdiv(a, b):
    return -(-a // b)


def actor_mlp_kernel(x_ref, w1_ref, b1_ref, w2_ref, b2_ref, w3_ref, b3_ref, o_ref):
    """Fused 3-layer MLP: relu(x@W1+b1) -> relu(.@W2+b2) -> tanh(.@W3+b3)."""
    cdt = w1_ref.dtype  # MXU input dtype (bf16); all matmuls accumulate in f32
    # fc1 + ReLU (x is already bf16 from the wrapper)
    h1 = jnp.dot(x_ref[...], w1_ref[...], preferred_element_type=jnp.float32)
    h1 = jnp.maximum(h1 + b1_ref[...], 0.0)
    # fc2 + ReLU
    h2 = jnp.dot(h1.astype(cdt), w2_ref[...], preferred_element_type=jnp.float32)
    h2 = jnp.maximum(h2 + b2_ref[...], 0.0)
    # mu head (lane-dense, padded to 128*k outputs) + tanh
    mu = jnp.dot(h2.astype(cdt), w3_ref[...], preferred_element_type=jnp.float32)
    o_ref[...] = jnp.tanh(mu + b3_ref[...]).astype(o_ref.dtype)


def prepare_actor_params(w1, b1, w2, b2, w3, b3, *, weight_dtype=jnp.bfloat16):
    """One-time param prep (hoisted OUT of the per-call forward path):
       - pad the mu head to a multiple of 128 output lanes (tanh(0)=0 -> harmless),
       - cast weights to bf16 for the MXU; biases stay f32 (added post f32 accum).
    Returns (params_tuple, n_actions)."""
    n_actions = w3.shape[1]
    n_out = _round_up(max(n_actions, 1), 128)
    w3p = jnp.pad(w3, ((0, 0), (0, n_out - n_actions)))
    b3p = jnp.pad(b3, ((0, 0), (0, n_out - n_actions)))
    params = (w1.astype(weight_dtype), b1.astype(jnp.float32),
              w2.astype(weight_dtype), b2.astype(jnp.float32),
              w3p.astype(weight_dtype), b3p.astype(jnp.float32))
    return params, n_actions


def _choose_tiling(batch, tile_b_max):
    """Pick (tile_b, padded_b, n_tiles): big sublane-aligned tiles to amortize the
    ~0.35 us/step grid overhead, no near-empty remainder tile, and an even number
    of steps >= 2 for large batches so v7x megacore can shard the batch axis."""
    n_tiles = max(1, _cdiv(batch, max(tile_b_max, 8)))
    if n_tiles == 1 and batch >= 2048:   # give v7x's 2 TensorCores work to split
        n_tiles = 2
    if n_tiles > 1 and n_tiles % 2:      # even step count shards cleanly across 2 TCs
        n_tiles += 1
    tile_b = _round_up(_cdiv(batch, n_tiles), 8)
    return tile_b, tile_b * n_tiles, n_tiles


@functools.partial(jax.jit, static_argnames=("n_actions", "tile_b_max", "out_dtype"))
def actor_forward(state, params, n_actions, *, tile_b_max=1024,
                  out_dtype=jnp.bfloat16):
    """state: [B, obs] (f32 or bf16). params: output of prepare_actor_params()."""
    w1, b1, w2, b2, w3, b3 = params
    batch, obs = state.shape
    fc1 = w1.shape[1]
    fc2 = w2.shape[1]
    n_out = w3.shape[1]  # padded, lane-dense

    # Cast state once (it's fed to the MXU as bf16 anyway) -> halves state DMA.
    x = state.astype(w1.dtype)

    tile_b, padded_b, n_tiles = _choose_tiling(batch, tile_b_max)
    if padded_b != batch:
        x = jnp.pad(x, ((0, padded_b - batch), (0, 0)))

    # Weights/biases: same block every grid step -> stay resident in VMEM.
    # (pipeline_mode=pl.Buffered(1) would halve their VMEM residency; footprint
    #  here is ~100 KiB so it's left at the default.)
    resident = lambda shape: pl.BlockSpec(shape, lambda i: (0, 0))

    w_itm = jnp.dtype(w1.dtype).itemsize
    o_itm = jnp.dtype(out_dtype).itemsize
    weight_bytes = ((w1.size + w2.size + w3.size) * w_itm
                    + (b1.size + b2.size + b3.size) * 4)
    cost = pl.CostEstimate(
        flops=2 * padded_b * (obs * fc1 + fc1 * fc2 + fc2 * n_out),
        transcendentals=padded_b * n_out,
        bytes_accessed=weight_bytes + padded_b * (obs * w_itm + n_out * o_itm),
    )

    # VMEM footprint: double-buffered state/out tiles + resident (double-buffered)
    # weights + f32 intermediates. Only override the default scoped limit when it
    # would not fit v5e's 16 MiB default (relevant if tile_b / layer widths grow).
    vmem_est = (2 * tile_b * obs * w_itm + 2 * tile_b * n_out * o_itm
                + 2 * weight_bytes + tile_b * (fc1 + fc2 + n_out) * 4)
    vmem_limit = None
    if vmem_est > (14 << 20):
        vmem_limit = min(int(vmem_est * 3 // 2), 64 << 20)

    out = pl.pallas_call(
        actor_mlp_kernel,
        out_shape=jax.ShapeDtypeStruct((padded_b, n_out), out_dtype),
        grid_spec=pltpu.PrefetchScalarGridSpec(
            num_scalar_prefetch=0,
            grid=(n_tiles,),
            in_specs=[
                pl.BlockSpec((tile_b, obs), lambda i: (i, 0)),   # state tile
                resident(w1.shape), resident(b1.shape),
                resident(w2.shape), resident(b2.shape),
                resident(w3.shape), resident(b3.shape),
            ],
            out_specs=pl.BlockSpec((tile_b, n_out), lambda i: (i, 0)),
        ),
        compiler_params=pltpu.CompilerParams(
            dimension_semantics=("parallel",),
            vmem_limit_bytes=vmem_limit),
        cost_estimate=cost,
    )(x, w1, b1, w2, b2, w3, b3)

    return out[:batch, :n_actions]


def init_linear(key, in_dim, out_dim):
    # Mimic torch.nn.Linear default init: U(-1/sqrt(in), 1/sqrt(in)).
    kw, kb = jax.random.split(key)
    bound = 1.0 / (in_dim ** 0.5)
    # Stored as [in, out] (transposed vs. PyTorch's [out, in]) for x @ W.
    w = jax.random.uniform(kw, (in_dim, out_dim), jnp.float32, -bound, bound)
    b = jax.random.uniform(kb, (1, out_dim), jnp.float32, -bound, bound)
    return w, b


if __name__ == "__main__":
    # Small, ActorNetwork-consistent shapes.
    batch = 20          # not a multiple of the tile -> exercises batch padding
    obs_space = 32
    fc1_dims = 128
    fc2_dims = 128
    n_actions_cfg = 2

    key = jax.random.PRNGKey(0)
    k_state, k1, k2, k3 = jax.random.split(key, 4)

    state = jax.random.normal(k_state, (batch, obs_space), jnp.float32)
    w1, b1 = init_linear(k1, obs_space, fc1_dims)
    w2, b2 = init_linear(k2, fc1_dims, fc2_dims)
    w3, b3 = init_linear(k3, fc2_dims, n_actions_cfg)

    # One-time weight prep (bf16 cast + mu-head padding) hoisted out of forward.
    params, n_actions = prepare_actor_params(w1, b1, w2, b2, w3, b3)

    # Tiny tile cap so this small test still exercises a multi-step batch grid.
    mu = actor_forward(state, params, n_actions, tile_b_max=8)
    mu = jax.block_until_ready(mu)
    assert mu.shape == (batch, n_actions)
    mu_f32 = mu.astype(jnp.float32)

    # Reference 1: same bf16-weight/activation, f32-accumulation math in plain JAX.
    cdt = jnp.bfloat16
    h1 = jnp.maximum(
        jnp.dot(state.astype(cdt), w1.astype(cdt),
                preferred_element_type=jnp.float32) + b1, 0.0)
    h2 = jnp.maximum(
        jnp.dot(h1.astype(cdt), w2.astype(cdt),
                preferred_element_type=jnp.float32) + b2, 0.0)
    ref_bf16 = jnp.tanh(
        jnp.dot(h2.astype(cdt), w3.astype(cdt),
                preferred_element_type=jnp.float32) + b3)
    assert jnp.allclose(mu_f32, ref_bf16, atol=2e-2, rtol=2e-2)

    # Reference 2: module semantics in full f32 (loose tol: bf16 weights + output).
    h1f = jnp.maximum(state @ w1 + b1, 0.0)
    h2f = jnp.maximum(h1f @ w2 + b2, 0.0)
    ref_f32 = jnp.tanh(h2f @ w3 + b3)
    assert jnp.allclose(mu_f32, ref_f32, atol=6e-2, rtol=6e-2)

    print("KERNEL_OK")
</pallas_src>

<mosaic_0001>
module attributes {stable_mosaic.version = 11 : i64} {
  func.func @actor_mlp_kernel(%arg0: i32, %arg1: memref<8x32xbf16, #tpu.memory_space<vmem>>, %arg2: memref<32x128xbf16, #tpu.memory_space<vmem>>, %arg3: memref<1x128xf32, #tpu.memory_space<vmem>>, %arg4: memref<128x128xbf16, #tpu.memory_space<vmem>>, %arg5: memref<1x128xf32, #tpu.memory_space<vmem>>, %arg6: memref<128x128xbf16, #tpu.memory_space<vmem>>, %arg7: memref<1x128xf32, #tpu.memory_space<vmem>>, %arg8: memref<8x128xbf16, #tpu.memory_space<vmem>>) attributes {dimension_semantics = [#tpu.dimension_semantics<parallel>], iteration_bounds = array<i64: 4>, scalar_prefetch = 0 : i64, scratch_operands = 0 : i64, tpu.core_type = #tpu.core_type<tc>, window_params = [{transform_indices = @transform_0, window_bounds = array<i64: 8, 32>}, {pipeline_mode = #tpu.pipeline_mode<synchronous>, transform_indices = @transform_1, window_bounds = array<i64: 32, 128>}, {pipeline_mode = #tpu.pipeline_mode<synchronous>, transform_indices = @transform_2, window_bounds = array<i64: 1, 128>}, {pipeline_mode = #tpu.pipeline_mode<synchronous>, transform_indices = @transform_3, window_bounds = array<i64: 128, 128>}, {pipeline_mode = #tpu.pipeline_mode<synchronous>, transform_indices = @transform_4, window_bounds = array<i64: 1, 128>}, {pipeline_mode = #tpu.pipeline_mode<synchronous>, transform_indices = @transform_5, window_bounds = array<i64: 128, 128>}, {pipeline_mode = #tpu.pipeline_mode<synchronous>, transform_indices = @transform_6, window_bounds = array<i64: 1, 128>}, {transform_indices = @transform_7, window_bounds = array<i64: 8, 128>}]} {
    %c0 = arith.constant 0 : index
    %c0_0 = arith.constant 0 : index
    %0 = vector.load %arg1[%c0, %c0_0] : memref<8x32xbf16, #tpu.memory_space<vmem>>, vector<8x32xbf16>
    %c0_1 = arith.constant 0 : index
    %c0_2 = arith.constant 0 : index
    %1 = vector.load %arg2[%c0_1, %c0_2] : memref<32x128xbf16, #tpu.memory_space<vmem>>, vector<32x128xbf16>
    %cst = arith.constant dense<0.000000e+00> : vector<8x128xf32>
    %2 = tpu.matmul %0, %1, %cst {dimension_numbers = #tpu.dot_dimension_numbers<[1], [0], [0], [1], [0, 0, 1, 1], [], []>} : vector<8x32xbf16>, vector<32x128xbf16>, vector<8x128xf32> -> vector<8x128xf32>
    %c0_3 = arith.constant 0 : index
    %c0_4 = arith.constant 0 : index
    %3 = vector.load %arg3[%c0_3, %c0_4] : memref<1x128xf32, #tpu.memory_space<vmem>>, vector<1x128xf32>
    %4 = vector.broadcast %3 : vector<1x128xf32> to vector<8x128xf32>
    %5 = arith.addf %2, %4 : vector<8x128xf32>
    %cst_5 = arith.constant 0.000000e+00 : f32
    %6 = vector.broadcast %cst_5 : f32 to vector<8x128xf32>
    %7 = arith.maximumf %5, %6 : vector<8x128xf32>
    %8 = arith.truncf %7 : vector<8x128xf32> to vector<8x128xbf16>
    %c0_6 = arith.constant 0 : index
    %c0_7 = arith.constant 0 : index
    %9 = vector.load %arg4[%c0_6, %c0_7] : memref<128x128xbf16, #tpu.memory_space<vmem>>, vector<128x128xbf16>
    %cst_8 = arith.constant dense<0.000000e+00> : vector<8x128xf32>
    %10 = tpu.matmul %8, %9, %cst_8 {dimension_numbers = #tpu.dot_dimension_numbers<[1], [0], [0], [1], [0, 0, 1, 1], [], []>} : vector<8x128xbf16>, vector<128x128xbf16>, vector<8x128xf32> -> vector<8x128xf32>
    %c0_9 = arith.constant 0 : index
    %c0_10 = arith.constant 0 : index
    %11 = vector.load %arg5[%c0_9, %c0_10] : memref<1x128xf32, #tpu.memory_space<vmem>>, vector<1x128xf32>
    %12 = vector.broadcast %11 : vector<1x128xf32> to vector<8x128xf32>
    %13 = arith.addf %10, %12 : vector<8x128xf32>
    %cst_11 = arith.constant 0.000000e+00 : f32
    %14 = vector.broadcast %cst_11 : f32 to vector<8x128xf32>
    %15 = arith.maximumf %13, %14 : vector<8x128xf32>
    %16 = arith.truncf %15 : vector<8x128xf32> to vector<8x128xbf16>
    %c0_12 = arith.constant 0 : index
    %c0_13 = arith.constant 0 : index
    %17 = vector.load %arg6[%c0_12, %c0_13] : memref<128x128xbf16, #tpu.memory_space<vmem>>, vector<128x128xbf16>
    %cst_14 = arith.constant dense<0.000000e+00> : vector<8x128xf32>
    %18 = tpu.matmul %16, %17, %cst_14 {dimension_numbers = #tpu.dot_dimension_numbers<[1], [0], [0], [1], [0, 0, 1, 1], [], []>} : vector<8x128xbf16>, vector<128x128xbf16>, vector<8x128xf32> -> vector<8x128xf32>
    %c0_15 = arith.constant 0 : index
    %c0_16 = arith.constant 0 : index
    %19 = vector.load %arg7[%c0_15, %c0_16] : memref<1x128xf32, #tpu.memory_space<vmem>>, vector<1x128xf32>
    %20 = vector.broadcast %19 : vector<1x128xf32> to vector<8x128xf32>
    %21 = arith.addf %18, %20 : vector<8x128xf32>
    %22 = math.tanh %21 : vector<8x128xf32>
    %23 = arith.truncf %22 : vector<8x128xf32> to vector<8x128xbf16>
    %c0_17 = arith.constant 0 : index
    %c0_18 = arith.constant 0 : index
    %24 = vector.load %arg8[%c0_17, %c0_18] : memref<8x128xbf16, #tpu.memory_space<vmem>>, vector<8x128xbf16>
    tpu.vector_store %arg8[%c0_17, %c0_18], %23 {strides = array<i32>} : memref<8x128xbf16, #tpu.memory_space<vmem>>, vector<8x128xbf16>,
    return
  }
  func.func @transform_0(%arg0: i32) -> (i32, i32) {
    %c0_i32 = arith.constant 0 : i32
    %c0_i32_0 = arith.constant 0 : i32
    return %arg0, %c0_i32 : i32, i32
  }
  func.func @transform_1(%arg0: i32) -> (i32, i32) {
    %c0_i32 = arith.constant 0 : i32
    %c0_i32_0 = arith.constant 0 : i32
    %c0_i32_1 = arith.constant 0 : i32
    return %c0_i32, %c0_i32_0 : i32, i32
  }
  func.func @transform_2(%arg0: i32) -> (i32, i32) {
    %c0_i32 = arith.constant 0 : i32
    %c0_i32_0 = arith.constant 0 : i32
    %c0_i32_1 = arith.constant 0 : i32
    return %c0_i32, %c0_i32_0 : i32, i32
  }
  func.func @transform_3(%arg0: i32) -> (i32, i32) {
    %c0_i32 = arith.constant 0 : i32
    %c0_i32_0 = arith.constant 0 : i32
    %c0_i32_1 = arith.constant 0 : i32
    return %c0_i32, %c0_i32_0 : i32, i32
  }
  func.func @transform_4(%arg0: i32) -> (i32, i32) {
    %c0_i32 = arith.constant 0 : i32
    %c0_i32_0 = arith.constant 0 : i32
    %c0_i32_1 = arith.constant 0 : i32
    return %c0_i32, %c0_i32_0 : i32, i32
  }
  func.func @transform_5(%arg0: i32) -> (i32, i32) {
    %c0_i32 = arith.constant 0 : i32
    %c0_i32_0 = arith.constant 0 : i32
    %c0_i32_1 = arith.constant 0 : i32
    return %c0_i32, %c0_i32_0 : i32, i32
  }
  func.func @transform_6(%arg0: i32) -> (i32, i32) {
    %c0_i32 = arith.constant 0 : i32
    %c0_i32_0 = arith.constant 0 : i32
    %c0_i32_1 = arith.constant 0 : i32
    return %c0_i32, %c0_i32_0 : i32, i32
  }
  func.func @transform_7(%arg0: i32) -> (i32, i32) {
    %c0_i32 = arith.constant 0 : i32
    %c0_i32_0 = arith.constant 0 : i32
    return %arg0, %c0_i32 : i32, i32
  }
}

</mosaic_0001>

<bundles_post_ra>
// kernel: actor_forward.1
= control target key start
LH: loop header
LB: loop body
LE: loop exit
PB: predicated region body
PF: predicated region fallthrough
CT: control target
= control target key end

     0   :  { %12 = vsyncpa [#allocation3], 0  ;;  %s1109_s0 = inlined_call_operand.vmem [shape: bf16[32,32], index: 0, kind: input, shape index: {}]   ;;  %s1110_s1 = inlined_call_operand.hbm [shape: bf16[32,128], index: 1, kind: input, shape index: {}]   ;;  %s1111_s2 = inlined_call_operand.vmem [shape: f32[1,128], index: 2, kind: input, shape index: {}]   ;;  %s1112_s3 = inlined_call_operand.vmem [shape: bf16[128,128], index: 3, kind: input, shape index: {}]   ;;  %s1113_s4 = inlined_call_operand.vmem [shape: f32[1,128], index: 4, kind: input, shape index: {}]   ;;  %s1114_s5 = inlined_call_operand.hbm [shape: bf16[128,128], index: 5, kind: input, shape index: {}]   ;;  %s1115_s6 = inlined_call_operand.vmem [shape: f32[1,128], index: 6, kind: input, shape index: {}]   ;;  %s1116_s7 = inlined_call_operand.vmem [shape: bf16[32,128], index: 7, kind: output, shape index: {}]  }
   0x1   :  { %13 = vsyncpa [#allocation5], 0  ;;  %s952_s24 = smov 0  }
   0x2 LB: > { %s958_s25 = sadd.s32 4294967295, %s904_s24   ;;  %p679_p0 = scmp.ge.s32.totalorder %s904_s24, 1  ;;  %s904_s24 = sphi %s952_s24, %s19_s24  }
   0x3   : > { %p202_p1 = scmp.lt.s32.totalorder %s904_s24, 5  ;;  %s906_s26 = smov [#allocation2]  }
   0x4   : > { %s214_s27 = sshll.u32 %s906_s26, 4  ;;  %p1117_p3 = scmp.eq.s32.totalorder %s958_s25, 0  ;;  %s215_s27 = int_to_ptr.vmem [resolvable:$true] %s214_s27 }
   0x5   : > { %p962_p2 = pnand %p679_p0, %p202_p1  ;;  %s907_s29 = smov [#allocation4]  }
   0x6   : > { %s236_s30 = sshll.u32 %s907_s29, 4  ;;  %s834_s11 = scalar_lea.hbm %s1110_s1, 256  ;;  %s975_s30 = int_to_ptr.vmem [resolvable:$true] %s236_s30 }
   0x7   : > { %s1119_s28 = scalar_select %p962_p2, 1, 0 }
   0x8   : > { %p789_p4 = pneg %p962_p2  ;;  %p835_p6 = scmp.ne.s32.totalorder %s1110_s1, %s834_s11 }
   0x9   : > { %p841_p10 = scmp.lt.u32.totalorder %s834_s11, %s1110_s1 }
   0xa   : > { %p971_p5 = pnand %p1117_p3, %p789_p4 }
   0xc   : > { %p836_p7 = pneg %p971_p5 }
   0xe   : > { %p837_p8 = pnand %p836_p7, %p835_p6 }
  0x10   : > { %p838_p9 = pneg %p837_p8 }
  0x12   : > { %p843_p11 = pnand %p841_p10, %p838_p9 }
  0x14   : > { %846 = shalt.err (!%p843_p11)
}
  0x15   : > { %s847_s16 = scalar_lea.vmem %s215_s27, 256  ;;  %p855_p1 = scmp.lt.s32.totalorder %s215_s27, %s215_s27 }
  0x16   : > { %p848_p12 = scmp.ne.s32.totalorder %s215_s27, %s847_s16  ;;  %p856_p4 = scmp.lt.s32.totalorder %s847_s16, %s847_s16 }
  0x18   : > { %p850_p13 = pnand %p848_p12, %p836_p7  ;;  %p857_p3 = por %p856_p4, %p855_p1 }
  0x1a   : > { %p851_p0 = pneg %p850_p13 }
  0x1c   : > { %p858_p2 = pnand %p857_p3, %p851_p0 }
  0x1e   : > { %861 = shalt.err (!%p858_p2)
}
  0x1f   : > { %s908_s17 = smov 64   ;;  %s909_s18 = smov 4  }
  0x20   : > { %792 = dma.hbm_to_vmem [thread:$0]  (!%p971_p5), %s1110_s1, 256, %s215_s27, [#allocation3], %s908_s17, %s908_s17, %s909_s18  }
  0x21   : > { %s862_s23 = scalar_lea.hbm %s1114_s5, 1024 }
  0x22   : > { %p863_p6 = scmp.ne.s32.totalorder %s1114_s5, %s862_s23  ;;  %p869_p8 = scmp.lt.u32.totalorder %s862_s23, %s1114_s5 }
  0x24   : > { %p865_p2 = pnand %p863_p6, %p836_p7 }
  0x26   : > { %p866_p3 = pneg %p865_p2 }
  0x28   : > { %p871_p9 = pnand %p869_p8, %p866_p3 }
  0x2a   : > { %874 = shalt.err (!%p871_p9)
}
  0x2b   : > { %s875_s27 = scalar_lea.vmem %s975_s30, 1024  ;;  %p883_p13 = scmp.lt.s32.totalorder %s975_s30, %s975_s30 }
  0x2c   : > { %p876_p10 = scmp.ne.s32.totalorder %s975_s30, %s875_s27  ;;  %p884_p0 = scmp.lt.s32.totalorder %s875_s27, %s875_s27 }
  0x2e   : > { %p878_p11 = pnand %p876_p10, %p836_p7  ;;  %p885_p1 = por %p884_p0, %p883_p13 }
  0x30   : > { %p879_p12 = pneg %p878_p11 }
  0x32   : > { %p886_p4 = pnand %p885_p1, %p879_p12 }
  0x34   : > { %889 = shalt.err (!%p886_p4)
}
  0x35   : > { %795 = dma.hbm_to_vmem [thread:$0]  (!%p971_p5), %s1114_s5, 1024, %s975_s30, [#allocation5], %s908_s17, %s908_s17, %s909_s18  }
  0x36   : > { %p1121_p6 = scmp.ne.s32.totalorder %s1119_s28, 0 }
  0x37   : > { %p1122_p2 = scmp.eq.s32.totalorder (!%p1121_p6), %s958_s25, 0 }
  0x38   : > { %262 = sbr.rel (%p1121_p6) target bundleno = 741 (0x2e5), region = 48 }
  0x3f   : > { %895 = dma.done.wait (%p1122_p2), [#allocation3], 256   ;;  %p1123_p7 = pmov %p1122_p2 }
  0x40   : > { %p1124_p3 = pmov %p1122_p2 }
  0x41   : > { %897 = vsyncadd (%p1123_p7), [#allocation3], 4294967040 }
  0x42   : > { %899 = dma.done.wait (%p1124_p3), [#allocation5], 1024   ;;  %p1125_p8 = pmov %p1122_p2 }
  0x43   : > { %p296_p9 = scmp.lt.s32.totalorder %s958_s25, 3  ;;  %v910_v0 = vmov 0.0   ;;  %vm911_vm0 = vmmov 0   ;;  %v814_v1 = vld [vmem:[#allocation2] sm:$0xff]   ;;  %v815_v2 = vld [vmem:[#allocation2 + $0x8] sm:$0xff]   ;;  %vm329_vm1 = vcmask 261120  }
  0x44   : > { %901 = vsyncadd (%p1125_p8), [#allocation5], 4294966272  ;;  %733 = vmatprep.subr.bf16.mxu0 %v910_v0  ;;  %737 = vmatprep.mubr.msk.bf16.mxu0 %vm911_vm0, %v910_v0  ;;  %v816_v3 = vld [vmem:[%s1112_s3] sm:$0xff]   ;;  %v817_v4 = vld [vmem:[%s1112_s3 + $0x8] sm:$0xff]  }
  0x45   : > { %741 = vmatprep.subr.bf16.mxu1 %v910_v0  ;;  %757 = vmatprep.mubr.msk.bf16.mxu1 %vm911_vm0, %v910_v0  ;;  %s1127_s25 = smov (!%p296_p9, %s958_s25), 3  ;;  %v818_v6 = vld [vmem:[%s1112_s3 + $0x10] sm:$0xff]   ;;  %v819_v7 = vld [vmem:[%s1112_s3 + $0x18] sm:$0xff]   ;;  %v820_v8 = vld [vmem:[%s1112_s3 + $0x20] sm:$0xff]  }
  0x46   : > { %s686_s28 = sshll.u32 %s1127_s25, 2  ;;  %734 = vmatpush3.bf16.msra.mxu0 %v814_v1  ;;  %742 = vmatpush3.bf16.msra.mxu1 %v816_v3  ;;  %v821_v9 = vld [vmem:[%s1112_s3 + $0x28] sm:$0xff]   ;;  %v822_v10 = vld [vmem:[%s1112_s3 + $0x30] sm:$0xff]   ;;  %v823_v11 = vld [vmem:[%s1112_s3 + $0x38] sm:$0xff]  }
  0x47   : > { %735 = vmatprep.subr.bf16.mxu0 %v910_v0  ;;  %s299_s13 = scalar_lea.vmem %s1109_s0, %s686_s28  ;;  %743 = vmatprep.subr.bf16.mxu1 %v910_v0  ;;  %v824_v12 = vld [vmem:[#allocation4] sm:$0xff]   ;;  %v825_v13 = vld [vmem:[#allocation4 + $0x8] sm:$0xff]   ;;  %v826_v14 = vld [vmem:[#allocation4 + $0x10] sm:$0xff]   ;;  %s303_s18 = scalar_lea.vmem %s1116_s7, %s686_s28 }
  0x48   : > { %v305_v5 = vld [vmem:[%s299_s13] sm:$0xf]  ;;  %v827_v15 = vld [vmem:[#allocation4 + $0x18] sm:$0xff]   ;;  %v828_v16 = vld [vmem:[#allocation4 + $0x20] sm:$0xff]  }
  0x49   : > { %v829_v17 = vld [vmem:[#allocation4 + $0x28] sm:$0xff]   ;;  %v688_v18 = vld [vmem:[%s1111_s2] ss:$0 sm:$0xff]  ;;  %v831_v27 = vld [vmem:[#allocation4 + $0x38] sm:$0xff]  }
  0x4a   : > { %736 = vmatpush3.bf16.msra.mxu0 %v815_v2  ;;  %744 = vmatpush3.bf16.msra.mxu1 %v817_v4  ;;  %v830_v26 = vld [vmem:[#allocation4 + $0x30] sm:$0xff]  }
  0x4b   : > { %761 = vmatprep.subr.bf16.mxu0 %v910_v0  ;;  %745 = vmatprep.subr.bf16.mxu1 %v910_v0  ;;  %v692_v28 = vld [vmem:[%s1113_s4] ss:$0 sm:$0xff] }
  0x4c   : > { %v701_v36 = vld [vmem:[%s1115_s6] ss:$0 sm:$0xff] }
  0x4d   : > { %738 = vmatmul.mubr.msk.bf16.vlgmr.msra.gmra.mrb[0].mxu0 %vm329_vm1, %v305_v5 }
  0x4e   : > { %777 = vmatprep.mubr.msk.bf16.mxu0 %vm911_vm0, %v910_v0  ;;  %746 = vmatpush3.bf16.msra.mxu1 %v818_v6 }
  0x4f   : > { %747 = vmatprep.subr.bf16.mxu1 %v910_v0  ;;  %762 = vmatpush3.bf16.msra.mxu0 %v824_v12 }
  0x50   : > { %763 = vmatprep.subr.bf16.mxu0 %v910_v0 }
  0x52   : > { %748 = vmatpush3.bf16.msra.mxu1 %v819_v7 }
  0x53   : > { %749 = vmatprep.subr.bf16.mxu1 %v910_v0  ;;  %764 = vmatpush3.bf16.msra.mxu0 %v825_v13 }
  0x54   : > { %765 = vmatprep.subr.bf16.mxu0 %v910_v0 }
  0x56   : > { %750 = vmatpush3.bf16.msra.mxu1 %v820_v8 }
  0x57   : > { %751 = vmatprep.subr.bf16.mxu1 %v910_v0  ;;  %766 = vmatpush3.bf16.msra.mxu0 %v826_v14 }
  0x58   : > { %767 = vmatprep.subr.bf16.mxu0 %v910_v0 }
  0x5a   : > { %752 = vmatpush3.bf16.msra.mxu1 %v821_v9 }
  0x5b   : > { %753 = vmatprep.subr.bf16.mxu1 %v910_v0  ;;  %768 = vmatpush3.bf16.msra.mxu0 %v827_v15 }
  0x5c   : > { %769 = vmatprep.subr.bf16.mxu0 %v910_v0 }
  0x5e   : > { %754 = vmatpush3.bf16.msra.mxu1 %v822_v10 }
  0x5f   : > { %755 = vmatprep.subr.bf16.mxu1 %v910_v0  ;;  %770 = vmatpush3.bf16.msra.mxu0 %v828_v16 }
  0x60   : > { %771 = vmatprep.subr.bf16.mxu0 %v910_v0 }
  0x62   : > { %756 = vmatpush3.bf16.msra.mxu1 %v823_v11 }
  0x63   : > { %772 = vmatpush3.bf16.msra.mxu0 %v829_v17 }
  0x64   : > { %773 = vmatprep.subr.bf16.mxu0 %v910_v0 }
  0x67   : > { %774 = vmatpush3.bf16.msra.mxu0 %v830_v26 }
  0x68   : > { %775 = vmatprep.subr.bf16.mxu0 %v910_v0 }
  0x6b   : > { %776 = vmatpush3.bf16.msra.mxu0 %v831_v27 }
 0x120   : > { %v367_v19 = vpop.f32.mrb[0].mxu0 }
 0x121   : > { %v368_v20 = vadd.f32 %v688_v18, %v367_v19  ;;  %v739_v21 = vpop.f32.mrb[1].mxu0 }
 0x122   : > { %v370_v22 = vpop.f32.mrb[2].mxu0 }
 0x123   : > { %v373_v23 = vmax.f32 %v368_v20, 0.0  ;;  %v740_v24 = vpop.f32.mrb[3].mxu0 }
 0x125   : > { %v374_v25 = vpack.c.bf16 %v373_v23, %v373_v23 }
 0x127   : > { %758 = vmatmul.mubr.bf16.vlgmr.msra.gmra.mrb[0].mxu1 %v374_v25 }
 0x1fa   : > { %v480_v29 = vpop.f32.mrb[0].mxu1 }
 0x1fb   : > { %v481_v30 = vadd.f32 %v692_v28, %v480_v29  ;;  %v759_v31 = vpop.f32.mrb[1].mxu1 }
 0x1fc   : > { %v483_v32 = vpop.f32.mrb[2].mxu1 }
 0x1fd   : > { %v486_v33 = vmax.f32 %v481_v30, 0.0  ;;  %v760_v34 = vpop.f32.mrb[3].mxu1 }
 0x1ff   : > { %v487_v35 = vpack.c.bf16 %v486_v33, %v486_v33 }
 0x201   : > { %778 = vmatmul.mubr.bf16.vlgmr.msra.gmra.mrb[4].mxu0 %v487_v35 }
 0x2d4   : > { %v593_v37 = vpop.f32.mrb[4].mxu0 }
 0x2d5   : > { %v594_v38 = vadd.f32 %v701_v36, %v593_v37  ;;  %v779_v39 = vpop.f32.mrb[5].mxu0 }
 0x2d6   : > { %v596_v40 = vpop.f32.mrb[6].mxu0 }
 0x2d7   : > { %832 = vtanh.f32 %v594_v38  ;;  %v780_v41 = vpop.f32.mrb[7].mxu0 }
 0x2e1   : > { %v833_v42 = vpop.eup %832 }
 0x2e2   : > { %v600_v43 = vpack.c.bf16 %v833_v42, %v833_v42 }
 0x2e4   : > { %601 = vst [vmem:[%s303_s18] sm:$0xf] %v600_v43 }
 0x2e5 PF: > { %s19_s24 = sadd.s32 1, %s904_s24  }
 0x2e6   : > { %p16_p5 = scmp.ge.s32.totalorder %s19_s24, 6  }
 0x2e8   :  { %18 = sbr.rel (!%p16_p5) target bundleno = 2 (0x2), region = 87 }
 0x2ef   :  { %621 = vsyncpa [#allocation3], 1 }
 0x2f0   :  { %623 = vsyncpa [#allocation3 + $0x1], 1 }
 0x2f1   :  { %624 = vsyncpa [#allocation5], 1 }

</bundles_post_ra>
